<compile_context>
chip_gen: v7x
topology: tpu7x:2x2x1
jax: 0.10.0
libtpu: 0.0.40
codegen_flags: <defaults>
</compile_context>

<pallas_src>
from collections import namedtuple

import numpy as np
import jax
import jax.numpy as jnp
from jax.experimental import pallas as pl
from jax.experimental.pallas import tpu as pltpu


# ----------------------------------------------------------------------------
# Pallas kernel: one lane-dense matmul + bias.
# ----------------------------------------------------------------------------
def _upsample_kernel(x_ref, band_ref, bias_ref, o_ref):
    # x_ref    : (M, K)        M = N*Hg output row-groups, K = E*Wp*Cin taps
    # band_ref : (K, swc_blk)  banded phase weights (output-lane block)
    # bias_ref : (1, swc_blk)  bias tiled over (row-phase, ow)
    # o_ref    : (M, swc_blk)  lane-dense folded output rows
    acc = jnp.dot(x_ref[...], band_ref[...],
                  preferred_element_type=jnp.float32)
    o_ref[...] = (acc + bias_ref[...]).astype(o_ref.dtype)


# ----------------------------------------------------------------------------
# Static geometry of the stride-s phase decomposition.
# ----------------------------------------------------------------------------
_Geom = namedtuple("_Geom",
                   "s Ho Wo Hg Wg eh_list ew_list E "
                   "padlo_h padhi_h padlo_w padhi_w Hp Wp")


def _geometry(H, W, KH, KW, stride, padding, output_padding):
    s = stride
    Ho = (H - 1) * s - 2 * padding + KH + output_padding
    Wo = (W - 1) * s - 2 * padding + KW + output_padding
    assert Ho % s == 0 and Wo % s == 0, "phase decomposition assumes s | Ho, Wo"
    Hg, Wg = Ho // s, Wo // s

    # Output o = s*m + r pulls input i = m + e with kernel index
    # k = r + padding - s*e; e ranges over taps with 0 <= k < K.
    def tap_range(K):
        e_min = min(-(-(r + padding - K + 1) // s) for r in range(s))  # ceil
        e_max = max((r + padding) // s for r in range(s))
        return e_min, e_max

    eh_min, eh_max = tap_range(KH)
    ew_min, ew_max = tap_range(KW)
    padlo_h, padhi_h = max(0, -eh_min), max(0, Hg - H + eh_max)
    padlo_w, padhi_w = max(0, -ew_min), max(0, Wg - W + ew_max)
    Hp, Wp = H + padlo_h + padhi_h, W + padlo_w + padhi_w
    eh_list = tuple(range(eh_min, eh_max + 1))
    ew_list = tuple(range(ew_min, ew_max + 1))
    return _Geom(s, Ho, Wo, Hg, Wg, eh_list, ew_list, len(eh_list),
                 padlo_h, padhi_h, padlo_w, padhi_w, Hp, Wp)


# ----------------------------------------------------------------------------
# Weight-only precompute: call ONCE per weight set and cache the result.
# ----------------------------------------------------------------------------
def build_upsampling_band(weight, bias, *, H, W, stride=2, padding,
                          output_padding):
    """Builds the banded phase-weight matrix and tiled bias row.

    weight : (Cin, Cout, KH, KW)  PyTorch ConvTranspose2d layout
    bias   : (Cout,)
    Returns
      band     : (E*Wp*Cin, s*Wo*Cout) f32
      bias_row : (1, s*Wo*Cout)        f32
    """
    Cin, Cout, KH, KW = weight.shape
    g = _geometry(H, W, KH, KW, stride, padding, output_padding)
    s = g.s
    swc = s * g.Wo * Cout

    # Static 0/1 selectors (trace-time numpy constants).
    sel_h = np.zeros((g.E, s, KH), np.float32)            # [e, r_h, kh]
    for ei, e in enumerate(g.eh_list):
        for r in range(s):
            k = r + padding - s * e
            if 0 <= k < KH:
                sel_h[ei, r, k] = 1.0
    sel_w = np.zeros((g.Wp, g.Wo, KW), np.float32)        # [w_in(padded), ow, kw]
    for ow in range(g.Wo):
        l, r = divmod(ow, s)
        for e in g.ew_list:
            k = r + padding - s * e
            w_in = l + e + g.padlo_w
            if 0 <= k < KW and 0 <= w_in < g.Wp:
                sel_w[w_in, ow, k] = 1.0

    # band[(e, w_in, ci), (r_h, ow, co)] = W[ci, co, kh, kw] at its phase slot.
    band = jnp.einsum("era,zob,icab->eziroc",
                      jnp.asarray(sel_h), jnp.asarray(sel_w), weight,
                      precision=jax.lax.Precision.HIGHEST)
    band = band.reshape(g.E * g.Wp * Cin, swc)
    bias_row = jnp.tile(bias, s * g.Wo).reshape(1, swc)
    # TODO(synk): for bf16 deployments cast `band` to bf16 here (halves the
    # dominant DMA); MXU still accumulates in f32 via preferred_element_type.
    return band, bias_row


def _num_lane_blocks(swc):
    # v7x has two TensorCores per chip: shard the output lanes so both stay
    # busy even at batch 1.  Single-TC v5e/v6e: one grid step = least overhead.
    try:
        kind = jax.devices()[0].device_kind.lower()
    except Exception:  # pragma: no cover - defensive
        kind = ""
    nb = 2 if "v7" in kind else 1
    while nb > 1 and swc % (nb * 128) != 0:
        nb -= 1
    return nb


# ----------------------------------------------------------------------------
# Forward pass (NHWC fast path — no relayouts).
# ----------------------------------------------------------------------------
def upsampling_forward_nhwc(x_nhwc, band, bias_row, *, KH, KW, stride=2,
                            padding, output_padding):
    """x_nhwc: (N, H, W, Cin) -> (N, Ho, Wo, Cout), NHWC end to end."""
    N, H, W, Cin = x_nhwc.shape
    g = _geometry(H, W, KH, KW, stride, padding, output_padding)
    swc = bias_row.shape[-1]
    Cout = swc // (g.s * g.Wo)
    K = band.shape[0]
    assert K == g.E * g.Wp * Cin

    # Tiny input glue: pad, fold (w, cin) onto lanes, fold the row tap onto
    # lanes too so the kernel is a single dot, and fold batch into M.
    x = jnp.pad(x_nhwc, ((0, 0), (g.padlo_h, g.padhi_h),
                         (g.padlo_w, g.padhi_w), (0, 0)))
    x = x.reshape(N, g.Hp, g.Wp * Cin)
    taps = [x[:, e + g.padlo_h: e + g.padlo_h + g.Hg, :] for e in g.eh_list]
    x_fold = jnp.concatenate(taps, axis=-1).reshape(N * g.Hg, K)
    M = N * g.Hg

    nb = _num_lane_blocks(swc)          # 1 on v5e/v6e, 2 on v7x
    swc_blk = swc // nb

    out = pl.pallas_call(
        _upsample_kernel,
        out_shape=jax.ShapeDtypeStruct((M, swc), x_nhwc.dtype),
        grid_spec=pltpu.PrefetchScalarGridSpec(
            num_scalar_prefetch=0,
            grid=(nb,),
            in_specs=[
                pl.BlockSpec((M, K), lambda j: (0, 0)),
                pl.BlockSpec((K, swc_blk), lambda j: (0, j)),
                pl.BlockSpec((1, swc_blk), lambda j: (0, j)),
            ],
            out_specs=pl.BlockSpec((M, swc_blk), lambda j: (0, j)),
        ),
        compiler_params=pltpu.CompilerParams(
            dimension_semantics=("parallel",)),
    )(x_fold, band, bias_row)

    # (N*Hg, s*Wo*Cout) is NHWC with the row phase folded in -> free reshape.
    return out.reshape(N, g.Ho, g.Wo, Cout)


def upsampling_forward(x_nchw, band, bias_row, *, KH, KW, stride=2,
                       padding, output_padding):
    """NCHW adapter matching the PyTorch module interface (reference check
    only; prefer the NHWC path in an NHWC end-to-end model)."""
    x_nhwc = jnp.transpose(x_nchw, (0, 2, 3, 1))
    y = upsampling_forward_nhwc(x_nhwc, band, bias_row, KH=KH, KW=KW,
                                stride=stride, padding=padding,
                                output_padding=output_padding)
    # TODO(synk): skip_connection branch (torch.cat with an external module's
    # cached __output__) is not modeled here since skip_connection=None.
    return jnp.transpose(y, (0, 3, 1, 2))


# ----------------------------------------------------------------------------
# Pure-numpy reference of PyTorch ConvTranspose2d semantics.
# ----------------------------------------------------------------------------
def _reference_conv_transpose(x, w, b, stride, padding, output_padding):
    N, Cin, H, W = x.shape
    _, Cout, KH, KW = w.shape
    Ho = (H - 1) * stride - 2 * padding + KH + output_padding
    Wo = (W - 1) * stride - 2 * padding + KW + output_padding
    y = np.zeros((N, Cout, Ho, Wo), dtype=np.float32)
    for kh in range(KH):
        for kw_ in range(KW):
            for ih in range(H):
                oh = ih * stride - padding + kh
                if not (0 <= oh < Ho):
                    continue
                for iw in range(W):
                    ow = iw * stride - padding + kw_
                    if not (0 <= ow < Wo):
                        continue
                    y[:, :, oh, ow] += np.einsum(
                        "nc,cd->nd", x[:, :, ih, iw], w[:, :, kh, kw_])
    return y + b[None, :, None, None]


if __name__ == "__main__":
    # Module config: Upsampling(c_in=4, c_out=8, kw=3)
    c_in, c_out, kw = 4, 8, 3
    padding = kw // 2
    output_padding = kw // 2
    N, H, W = 2, 16, 16

    key = jax.random.PRNGKey(0)
    kx, kw_key, kb = jax.random.split(key, 3)
    x = jax.random.normal(kx, (N, c_in, H, W), dtype=jnp.float32)
    # PyTorch ConvTranspose2d weight shape: (c_in, c_out, kH, kW)
    weight = jax.random.normal(kw_key, (c_in, c_out, kw, kw),
                               dtype=jnp.float32) * 0.1
    bias = jax.random.normal(kb, (c_out,), dtype=jnp.float32) * 0.1

    # Weight-only precompute: done once per weight set, outside the forward.
    band, bias_row = build_upsampling_band(
        weight, bias, H=H, W=W, stride=2, padding=padding,
        output_padding=output_padding)
    band = jax.block_until_ready(band)
    bias_row = jax.block_until_ready(bias_row)

    fwd = jax.jit(lambda a, bd, br: upsampling_forward(
        a, bd, br, KH=kw, KW=kw, stride=2, padding=padding,
        output_padding=output_padding))
    out = jax.block_until_ready(fwd(x, band, bias_row))

    ref = _reference_conv_transpose(np.asarray(x), np.asarray(weight),
                                    np.asarray(bias), 2, padding,
                                    output_padding)
    assert out.shape == ref.shape, (out.shape, ref.shape)
    np.testing.assert_allclose(np.asarray(out), ref, rtol=1e-4, atol=1e-4)
    print("KERNEL_OK")
</pallas_src>

<mosaic_0001>
module attributes {stable_mosaic.version = 11 : i64} {
  func.func @_upsample_kernel(%arg0: i32, %arg1: memref<32x136xf32, #tpu.memory_space<vmem>>, %arg2: memref<136x512xf32, #tpu.memory_space<vmem>>, %arg3: memref<1x512xf32, #tpu.memory_space<vmem>>, %arg4: memref<32x512xf32, #tpu.memory_space<vmem>>) attributes {dimension_semantics = [#tpu.dimension_semantics<parallel>], iteration_bounds = array<i64: 1>, scalar_prefetch = 0 : i64, scratch_operands = 0 : i64, tpu.core_type = #tpu.core_type<tc>, window_params = [{pipeline_mode = #tpu.pipeline_mode<synchronous>, transform_indices = @transform_0, window_bounds = array<i64: 32, 136>}, {transform_indices = @transform_1, window_bounds = array<i64: 136, 512>}, {transform_indices = @transform_2, window_bounds = array<i64: 1, 512>}, {transform_indices = @transform_3, window_bounds = array<i64: 32, 512>}]} {
    %c0 = arith.constant 0 : index
    %c0_0 = arith.constant 0 : index
    %0 = vector.load %arg1[%c0, %c0_0] : memref<32x136xf32, #tpu.memory_space<vmem>>, vector<32x136xf32>
    %c0_1 = arith.constant 0 : index
    %c0_2 = arith.constant 0 : index
    %1 = vector.load %arg2[%c0_1, %c0_2] : memref<136x512xf32, #tpu.memory_space<vmem>>, vector<136x512xf32>
    %cst = arith.constant dense<0.000000e+00> : vector<32x512xf32>
    %2 = tpu.matmul %0, %1, %cst {dimension_numbers = #tpu.dot_dimension_numbers<[1], [0], [0], [1], [0, 0, 1, 1], [], []>} : vector<32x136xf32>, vector<136x512xf32>, vector<32x512xf32> -> vector<32x512xf32>
    %c0_3 = arith.constant 0 : index
    %c0_4 = arith.constant 0 : index
    %3 = vector.load %arg3[%c0_3, %c0_4] : memref<1x512xf32, #tpu.memory_space<vmem>>, vector<1x512xf32>
    %4 = vector.broadcast %3 : vector<1x512xf32> to vector<32x512xf32>
    %5 = arith.addf %2, %4 : vector<32x512xf32>
    %c0_5 = arith.constant 0 : index
    %c0_6 = arith.constant 0 : index
    %6 = vector.load %arg4[%c0_5, %c0_6] : memref<32x512xf32, #tpu.memory_space<vmem>>, vector<32x512xf32>
    tpu.vector_store %arg4[%c0_5, %c0_6], %5 {strides = array<i32>} : memref<32x512xf32, #tpu.memory_space<vmem>>, vector<32x512xf32>,
    return
  }
  func.func @transform_0(%arg0: i32) -> (i32, i32) {
    %c0_i32 = arith.constant 0 : i32
    %c0_i32_0 = arith.constant 0 : i32
    %c0_i32_1 = arith.constant 0 : i32
    return %c0_i32, %c0_i32_0 : i32, i32
  }
  func.func @transform_1(%arg0: i32) -> (i32, i32) {
    %c0_i32 = arith.constant 0 : i32
    %c0_i32_0 = arith.constant 0 : i32
    return %c0_i32, %arg0 : i32, i32
  }
  func.func @transform_2(%arg0: i32) -> (i32, i32) {
    %c0_i32 = arith.constant 0 : i32
    %c0_i32_0 = arith.constant 0 : i32
    return %c0_i32, %arg0 : i32, i32
  }
  func.func @transform_3(%arg0: i32) -> (i32, i32) {
    %c0_i32 = arith.constant 0 : i32
    %c0_i32_0 = arith.constant 0 : i32
    return %c0_i32, %arg0 : i32, i32
  }
}

</mosaic_0001>

<bundles_post_ra>
// kernel: _lambda_.1
= control target key start
LH: loop header
LB: loop body
LE: loop exit
PB: predicated region body
PF: predicated region fallthrough
CT: control target
= control target key end

     0   :  { %vm112_vm0 = vcmask 64512   ;;  %s702_s1 = inlined_call_operand.vmem [shape: f32[136,512], index: 1, kind: input, shape index: {}]   ;;  %s703_s0 = inlined_call_operand.vmem [shape: f32[32,136], index: 0, kind: input, shape index: {}]   ;;  %s704_s2 = inlined_call_operand.vmem [shape: f32[1,512], index: 2, kind: input, shape index: {}]   ;;  %s705_s3 = inlined_call_operand.vmem [shape: f32[32,512], index: 3, kind: output, shape index: {}]  }
   0x1   :  { %v23_v0 = vld [vmem:[%s702_s1 + $0x8] sm:$0xff]  ;;  %v25_v2 = vld [vmem:[%s702_s1 + $0x18] sm:$0xff]  ;;  %v22_v5 = vld [vmem:[%s702_s1] sm:$0xff] }
   0x2   :  { %v27_v1 = vld [vmem:[%s702_s1 + $0x28] sm:$0xff]  ;;  %v29_v4 = vld [vmem:[%s702_s1 + $0x38] sm:$0xff]  ;;  %v26_v6 = vld [vmem:[%s702_s1 + $0x20] sm:$0xff] }
   0x3   :  { %v331_v3 = vpack.c.bf16 %v27_v1, %v23_v0  ;;  %v363_v7 = vpack.c.bf16 %v29_v4, %v25_v2  ;;  %v333_v8 = vpack.c.bf16 %v26_v6, %v22_v5  ;;  %v24_v9 = vld [vmem:[%s702_s1 + $0x10] sm:$0xff]  ;;  %v31_v11 = vld [vmem:[%s702_s1 + $0x48] sm:$0xff]  ;;  %v33_v14 = vld [vmem:[%s702_s1 + $0x58] sm:$0xff] }
   0x4   :  { %v28_v10 = vld [vmem:[%s702_s1 + $0x30] sm:$0xff]  ;;  %v35_v13 = vld [vmem:[%s702_s1 + $0x68] sm:$0xff]  ;;  %v37_v15 = vld [vmem:[%s702_s1 + $0x78] sm:$0xff] }
   0x5   :  { %332 = vmatprep.subr.bf16.mxu0 %v331_v3  ;;  %v365_v12 = vpack.c.bf16 %v28_v10, %v24_v9  ;;  %364 = vmatprep.subr.bf16.mxu1 %v363_v7  ;;  %v335_v16 = vpack.c.bf16 %v35_v13, %v31_v11  ;;  %v367_v17 = vpack.c.bf16 %v37_v15, %v33_v14  ;;  %v30_v18 = vld [vmem:[%s702_s1 + $0x40] sm:$0xff]  ;;  %v32_v20 = vld [vmem:[%s702_s1 + $0x50] sm:$0xff]  ;;  %v39_v23 = vld [vmem:[%s702_s1 + $0x88] sm:$0xff] }
   0x6   :  { %334 = vmatpush1.bf16.msra.mxu0 %v333_v8  ;;  %v34_v19 = vld [vmem:[%s702_s1 + $0x60] sm:$0xff]  ;;  %v36_v22 = vld [vmem:[%s702_s1 + $0x70] sm:$0xff]  ;;  %v43_v24 = vld [vmem:[%s702_s1 + $0xa8] sm:$0xff] }
   0x7   :  { %366 = vmatpush1.bf16.msra.mxu1 %v365_v12  ;;  %v337_v21 = vpack.c.bf16 %v34_v19, %v30_v18  ;;  %336 = vmatprep.subr.bf16.mxu0 %v335_v16  ;;  %v369_v25 = vpack.c.bf16 %v36_v22, %v32_v20  ;;  %v339_v26 = vpack.c.bf16 %v43_v24, %v39_v23  ;;  %v41_v27 = vld [vmem:[%s702_s1 + $0x98] sm:$0xff]  ;;  %v38_v29 = vld [vmem:[%s702_s1 + $0x80] sm:$0xff]  ;;  %v40_v32 = vld [vmem:[%s702_s1 + $0x90] sm:$0xff] }
   0x8   :  { %368 = vmatprep.subr.bf16.mxu1 %v367_v17  ;;  %v45_v28 = vld [vmem:[%s702_s1 + $0xb8] sm:$0xff]  ;;  %v42_v31 = vld [vmem:[%s702_s1 + $0xa0] sm:$0xff]  ;;  %v44_v33 = vld [vmem:[%s702_s1 + $0xb0] sm:$0xff] }
   0x9   :  { %v371_v30 = vpack.c.bf16 %v45_v28, %v41_v27  ;;  %v341_v34 = vpack.c.bf16 %v42_v31, %v38_v29  ;;  %v47_v35 = vld [vmem:[%s702_s1 + $0xc8] sm:$0xff]  ;;  %v49_v37 = vld [vmem:[%s702_s1 + $0xd8] sm:$0xff]  ;;  %v373_v38 = vpack.c.bf16 %v44_v33, %v40_v32  ;;  %v46_v41 = vld [vmem:[%s702_s1 + $0xc0] sm:$0xff] }
   0xa   :  { %338 = vmatpush1.bf16.msra.mxu0 %v337_v21  ;;  %v51_v36 = vld [vmem:[%s702_s1 + $0xe8] sm:$0xff]  ;;  %v53_v40 = vld [vmem:[%s702_s1 + $0xf8] sm:$0xff]  ;;  %v50_v42 = vld [vmem:[%s702_s1 + $0xe0] sm:$0xff] }
   0xb   :  { %370 = vmatpush1.bf16.msra.mxu1 %v369_v25  ;;  %340 = vmatprep.subr.bf16.mxu0 %v339_v26  ;;  %v343_v39 = vpack.c.bf16 %v51_v36, %v47_v35  ;;  %v375_v43 = vpack.c.bf16 %v53_v40, %v49_v37  ;;  %v48_v44 = vld [vmem:[%s702_s1 + $0xd0] sm:$0xff]  ;;  %v55_v46 = vld [vmem:[%s702_s1 + $0x108] sm:$0xff]  ;;  %v57_v48 = vld [vmem:[%s702_s1 + $0x118] sm:$0xff]  ;;  %v345_v50 = vpack.c.bf16 %v50_v42, %v46_v41 }
   0xc   :  { %372 = vmatprep.subr.bf16.mxu1 %v371_v30  ;;  %v52_v45 = vld [vmem:[%s702_s1 + $0xf0] sm:$0xff]  ;;  %v59_v47 = vld [vmem:[%s702_s1 + $0x128] sm:$0xff]  ;;  %v61_v49 = vld [vmem:[%s702_s1 + $0x138] sm:$0xff] }
   0xd   :  { %v377_v51 = vpack.c.bf16 %v52_v45, %v48_v44  ;;  %v347_v52 = vpack.c.bf16 %v59_v47, %v55_v46  ;;  %v54_v53 = vld [vmem:[%s702_s1 + $0x100] sm:$0xff]  ;;  %v56_v55 = vld [vmem:[%s702_s1 + $0x110] sm:$0xff]  ;;  %v379_v56 = vpack.c.bf16 %v61_v49, %v57_v48  ;;  %v63_v58 = vld [vmem:[%s702_s1 + $0x148] sm:$0xff]  ;;  %v92_v44 = vlaneseq }
   0xe   :  { %342 = vmatpush1.bf16.msra.mxu0 %v341_v34  ;;  %v58_v54 = vld [vmem:[%s702_s1 + $0x120] sm:$0xff]  ;;  %v60_v57 = vld [vmem:[%s702_s1 + $0x130] sm:$0xff]  ;;  %v67_v59 = vld [vmem:[%s702_s1 + $0x168] sm:$0xff] }
   0xf   :  { %374 = vmatpush1.bf16.msra.mxu1 %v373_v38  ;;  %344 = vmatprep.subr.bf16.mxu0 %v343_v39  ;;  %v65_v60 = vld [vmem:[%s702_s1 + $0x158] sm:$0xff]  ;;  %v349_v62 = vpack.c.bf16 %v58_v54, %v54_v53  ;;  %v381_v63 = vpack.c.bf16 %v60_v57, %v56_v55  ;;  %v351_v0 = vpack.c.bf16 %v67_v59, %v63_v58  ;;  %v62_v1 = vld [vmem:[%s702_s1 + $0x140] sm:$0xff]  ;;  %v64_v3 = vld [vmem:[%s702_s1 + $0x150] sm:$0xff]  ;;  %v93_v45 = vshrl.u32 %v92_v44, 7 }
  0x10   :  { %376 = vmatprep.subr.bf16.mxu1 %v375_v43  ;;  %v69_v61 = vld [vmem:[%s702_s1 + $0x178] sm:$0xff]  ;;  %v66_v2 = vld [vmem:[%s702_s1 + $0x160] sm:$0xff]  ;;  %v68_v5 = vld [vmem:[%s702_s1 + $0x170] sm:$0xff] }
  0x11   :  { %v383_v4 = vpack.c.bf16 %v69_v61, %v65_v60  ;;  %v71_v6 = vld [vmem:[%s702_s1 + $0x188] sm:$0xff]  ;;  %v73_v8 = vld [vmem:[%s702_s1 + $0x198] sm:$0xff]  ;;  %v353_v10 = vpack.c.bf16 %v66_v2, %v62_v1  ;;  %v70_v11 = vld [vmem:[%s702_s1 + $0x180] sm:$0xff]  ;;  %v385_v12 = vpack.c.bf16 %v68_v5, %v64_v3  ;;  %v94_v46 = vsub.s32 0, %v93_v45 }
  0x12   :  { %346 = vmatpush1.bf16.msra.mxu0 %v345_v50  ;;  %v75_v7 = vld [vmem:[%s702_s1 + $0x1a8] sm:$0xff]  ;;  %v77_v9 = vld [vmem:[%s702_s1 + $0x1b8] sm:$0xff]  ;;  %v74_v14 = vld [vmem:[%s702_s1 + $0x1a0] sm:$0xff]  ;;  %v102_v48 = vsub.s32 2, %v93_v45  ;;  %v98_v49 = vsub.s32 1, %v93_v45  ;;  %v106_v50 = vsub.s32 3, %v93_v45 }
  0x13   :  { %378 = vmatpush1.bf16.msra.mxu1 %v377_v51  ;;  %348 = vmatprep.subr.bf16.mxu0 %v347_v52  ;;  %v355_v13 = vpack.c.bf16 %v75_v7, %v71_v6  ;;  %v72_v15 = vld [vmem:[%s702_s1 + $0x190] sm:$0xff]  ;;  %v387_v17 = vpack.c.bf16 %v77_v9, %v73_v8  ;;  %v79_v18 = vld [vmem:[%s702_s1 + $0x1c8] sm:$0xff]  ;;  %v81_v21 = vld [vmem:[%s702_s1 + $0x1d8] sm:$0xff]  ;;  %v357_v23 = vpack.c.bf16 %v74_v14, %v70_v11 }
  0x14   :  { %380 = vmatprep.subr.bf16.mxu1 %v379_v56  ;;  %v76_v16 = vld [vmem:[%s702_s1 + $0x1b0] sm:$0xff]  ;;  %v83_v19 = vld [vmem:[%s702_s1 + $0x1e8] sm:$0xff]  ;;  %v85_v22 = vld [vmem:[%s702_s1 + $0x1f8] sm:$0xff] }
  0x15   :  { %v15_v20 = vld [vmem:[%s703_s0 + $0x8] sm:$0xff]  ;;  %v389_v24 = vpack.c.bf16 %v76_v16, %v72_v15  ;;  %v359_v25 = vpack.c.bf16 %v83_v19, %v79_v18  ;;  %v78_v26 = vld [vmem:[%s702_s1 + $0x1c0] sm:$0xff]  ;;  %v391_v28 = vpack.c.bf16 %v85_v22, %v81_v21  ;;  %v80_v29 = vld [vmem:[%s702_s1 + $0x1d0] sm:$0xff] }
  0x16   :  { %350 = vmatpush1.bf16.msra.mxu0 %v349_v62  ;;  %323 = vmatprep.mubr.msk.f32.mxu0 %vm112_vm0, %v15_v20  ;;  %v82_v27 = vld [vmem:[%s702_s1 + $0x1e0] sm:$0xff]  ;;  %v84_v30 = vld [vmem:[%s702_s1 + $0x1f0] sm:$0xff]  ;;  %v87_v33 = vld [vmem:[%s702_s1 + $0x208] sm:$0xff] }
  0x17   :  { %382 = vmatpush1.bf16.msra.mxu1 %v381_v63  ;;  %352 = vmatprep.subr.bf16.mxu0 %v351_v0  ;;  %v361_v31 = vpack.c.bf16 %v82_v27, %v78_v26  ;;  %v393_v32 = vpack.c.bf16 %v84_v30, %v80_v29  ;;  %v89_v34 = vld [vmem:[%s702_s1 + $0x218] sm:$0xff]  ;;  %v86_v35 = vld [vmem:[%s702_s1 + $0x200] sm:$0xff]  ;;  %v88_v36 = vld [vmem:[%s702_s1 + $0x210] sm:$0xff] }
  0x18   :  { %384 = vmatprep.subr.bf16.mxu1 %v383_v4  ;;  %327 = vmatprep.mubr.msk.f32.mxu1 %vm112_vm0, %v15_v20  ;;  %v14_v37 = vld [vmem:[%s703_s0] sm:$0xff]  ;;  %v17_v38 = vld [vmem:[%s703_s0 + $0x18] sm:$0xff]  ;;  %v16_v39 = vld [vmem:[%s703_s0 + $0x10] sm:$0xff] }
  0x19   :  { %v19_v40 = vld [vmem:[%s703_s0 + $0x28] sm:$0xff]  ;;  %v18_v41 = vld [vmem:[%s703_s0 + $0x20] sm:$0xff]  ;;  %v21_v42 = vld [vmem:[%s703_s0 + $0x38] sm:$0xff] }
  0x1a   :  { %354 = vmatpush1.bf16.msra.mxu0 %v353_v10  ;;  %v20_v43 = vld [vmem:[%s703_s0 + $0x30] sm:$0xff]  ;;  %v90_v47 = vld [vmem:[%s704_s2] sm:$0xf] }
  0x1b   :  { %386 = vmatpush1.bf16.msra.mxu1 %v385_v12  ;;  %356 = vmatprep.subr.bf16.mxu0 %v355_v13  ;;  %v95_v51 = vrot.slane %v90_v47, %v94_v46  ;;  %v103_v52 = vrot.slane %v90_v47, %v102_v48  ;;  %v99_v53 = vrot.slane %v90_v47, %v98_v49 }
  0x1c   :  { %388 = vmatprep.subr.bf16.mxu1 %v387_v17  ;;  %v107_v54 = vrot.slane %v90_v47, %v106_v50 }
  0x1e   :  { %358 = vmatpush1.bf16.msra.mxu0 %v357_v23 }
  0x1f   :  { %390 = vmatpush1.bf16.msra.mxu1 %v389_v24  ;;  %360 = vmatprep.subr.bf16.mxu0 %v359_v25 }
  0x20   :  { %392 = vmatprep.subr.bf16.mxu1 %v391_v28 }
  0x22   :  { %362 = vmatpush1.bf16.msra.mxu0 %v361_v31 }
  0x23   :  { %394 = vmatpush1.bf16.msra.mxu1 %v393_v32  ;;  %157 = vmatprep.subr.mxu0 %v87_v33 }
  0x24   :  { %246 = vmatprep.subr.mxu1 %v89_v34 }
  0x26   :  { %158 = vmatpush1.msra.mxu0 %v86_v35 }
  0x27   :  { %247 = vmatpush1.msra.mxu1 %v88_v36  ;;  %190 = vmatmul.mubr.f32.vlgmr.msra.gmra.mrb[0].mxu0 %v14_v37 }
  0x28   :  { %279 = vmatmul.mubr.f32.vlgmr.msra.gmra.mrb[0].mxu1 %v14_v37  ;;  %324 = vmatprep.mubr.msk.f32.mxu0 %vm112_vm0, %v17_v38 }
  0x29   :  { %328 = vmatprep.mubr.msk.f32.mxu1 %vm112_vm0, %v17_v38 }
  0x2b   :  { %196 = vmatmul.mubr.f32.gmra.mrb[2].mxu0 %v16_v39 }
  0x2c   :  { %285 = vmatmul.mubr.f32.gmra.mrb[2].mxu1 %v16_v39  ;;  %325 = vmatprep.mubr.msk.f32.mxu0 %vm112_vm0, %v19_v40 }
  0x2d   :  { %329 = vmatprep.mubr.msk.f32.mxu1 %vm112_vm0, %v19_v40 }
  0x2f   :  { %202 = vmatmul.mubr.f32.gmra.mrb[4].mxu0 %v18_v41 }
  0x30   :  { %291 = vmatmul.mubr.f32.gmra.mrb[4].mxu1 %v18_v41  ;;  %326 = vmatprep.mubr.msk.f32.mxu0 %vm112_vm0, %v21_v42 }
  0x31   :  { %330 = vmatprep.mubr.msk.f32.mxu1 %vm112_vm0, %v21_v42 }
  0x33   :  { %208 = vmatmul.mubr.f32.gmra.mrb[6].mxu0 %v20_v43 }
  0x34   :  { %297 = vmatmul.mubr.f32.gmra.mrb[6].mxu1 %v20_v43 }
  0xfa   :  { %v191_v55 = vpop.f32.mrb[0].mxu0 }
  0xfb   :  { %v192_v56 = vadd.f32 %v191_v55, %v95_v51  ;;  %v280_v57 = vpop.f32.mrb[0].mxu1  ;;  %v193_v58 = vpop.f32.mrb[1].mxu0 }
  0xfc   :  { %v281_v59 = vadd.f32 %v280_v57, %v103_v52  ;;  %v194_v60 = vadd.f32 %v193_v58, %v99_v53  ;;  %v282_v61 = vpop.f32.mrb[1].mxu1 }
  0xfd   :  { %303 = vst [vmem:[%s705_s3] sm:$0xff] %v192_v56  ;;  %v283_v62 = vadd.f32 %v282_v61, %v107_v54 }
  0xfe   :  { %305 = vst [vmem:[%s705_s3 + $0x10] sm:$0xff] %v281_v59  ;;  %304 = vst [vmem:[%s705_s3 + $0x8] sm:$0xff] %v194_v60  ;;  %v197_v63 = vpop.f32.mrb[2].mxu0 }
  0xff   :  { %306 = vst [vmem:[%s705_s3 + $0x18] sm:$0xff] %v283_v62  ;;  %v198_v0 = vadd.f32 %v197_v63, %v95_v51  ;;  %v286_v1 = vpop.f32.mrb[2].mxu1  ;;  %v199_v2 = vpop.f32.mrb[3].mxu0 }
 0x100   :  { %v287_v3 = vadd.f32 %v286_v1, %v103_v52  ;;  %v200_v4 = vadd.f32 %v199_v2, %v99_v53  ;;  %v288_v5 = vpop.f32.mrb[3].mxu1 }
 0x101   :  { %307 = vst [vmem:[%s705_s3 + $0x20] sm:$0xff] %v198_v0  ;;  %v289_v6 = vadd.f32 %v288_v5, %v107_v54 }
 0x102   :  { %309 = vst [vmem:[%s705_s3 + $0x30] sm:$0xff] %v287_v3  ;;  %308 = vst [vmem:[%s705_s3 + $0x28] sm:$0xff] %v200_v4  ;;  %v203_v7 = vpop.f32.mrb[4].mxu0 }
 0x103   :  { %310 = vst [vmem:[%s705_s3 + $0x38] sm:$0xff] %v289_v6  ;;  %v204_v8 = vadd.f32 %v203_v7, %v95_v51  ;;  %v292_v9 = vpop.f32.mrb[4].mxu1  ;;  %v205_v10 = vpop.f32.mrb[5].mxu0 }
 0x104   :  { %v293_v11 = vadd.f32 %v292_v9, %v103_v52  ;;  %v206_v12 = vadd.f32 %v205_v10, %v99_v53  ;;  %v294_v13 = vpop.f32.mrb[5].mxu1 }
 0x105   :  { %311 = vst [vmem:[%s705_s3 + $0x40] sm:$0xff] %v204_v8  ;;  %v295_v14 = vadd.f32 %v294_v13, %v107_v54 }
 0x106   :  { %313 = vst [vmem:[%s705_s3 + $0x50] sm:$0xff] %v293_v11  ;;  %312 = vst [vmem:[%s705_s3 + $0x48] sm:$0xff] %v206_v12  ;;  %v209_v15 = vpop.f32.mrb[6].mxu0 }
 0x107   :  { %314 = vst [vmem:[%s705_s3 + $0x58] sm:$0xff] %v295_v14  ;;  %v210_v16 = vadd.f32 %v209_v15, %v95_v51  ;;  %v298_v17 = vpop.f32.mrb[6].mxu1  ;;  %v211_v18 = vpop.f32.mrb[7].mxu0 }
 0x108   :  { %v299_v19 = vadd.f32 %v298_v17, %v103_v52  ;;  %v212_v20 = vadd.f32 %v211_v18, %v99_v53  ;;  %v300_v21 = vpop.f32.mrb[7].mxu1 }
 0x109   :  { %315 = vst [vmem:[%s705_s3 + $0x60] sm:$0xff] %v210_v16  ;;  %v301_v22 = vadd.f32 %v300_v21, %v107_v54 }
 0x10a   :  { %317 = vst [vmem:[%s705_s3 + $0x70] sm:$0xff] %v299_v19  ;;  %316 = vst [vmem:[%s705_s3 + $0x68] sm:$0xff] %v212_v20 }
 0x10b   :  { %318 = vst [vmem:[%s705_s3 + $0x78] sm:$0xff] %v301_v22 }

</bundles_post_ra>
